<compile_context>
chip_gen: v7x
topology: tpu7x:2x2x1
jax: 0.10.0
libtpu: 0.0.40
codegen_flags: <defaults>
</compile_context>

<pallas_src>
import functools
import math

import jax
import jax.numpy as jnp
from jax.experimental import pallas as pl
from jax.experimental.pallas import tpu as pltpu

_LANES = 128
_SUBLANES = 8
_MAX_BLOCK_ROWS = 2048          # (2048, 128) f32 = 1 MiB per input per buffer
_NUM_SPLITS = 2                 # leading "parallel" grid axis (v7x megacore)
_LOG2 = math.log(2.0)


def _round_up(x, m):
    return ((x + m - 1) // m) * m


def _logcosh_partial_kernel(yp_ref, yt_ref, out_ref, acc_ref, *, valid_rows):
    """Accumulate sum(log(cosh(yp - yt))) for this split into an (8,128) acc."""
    c = pl.program_id(0)          # parallel split (sharded across TCs on v7x)
    i = pl.program_id(1)          # serial reduction axis
    n_inner = pl.num_programs(1)

    @pl.when(i == 0)
    def _init():
        acc_ref[...] = jnp.zeros_like(acc_ref)

    block_rows = yp_ref.shape[0]

    d = yp_ref[...].astype(jnp.float32) - yt_ref[...].astype(jnp.float32)
    a = jnp.abs(d)
    # Stable log(cosh(x)); -log(2) kept per element for summation numerics.
    lc = a + jnp.log1p(jnp.exp(-2.0 * a)) - jnp.float32(_LOG2)

    # Mask rows past the logical end of the slab (ragged last block and any
    # fully out-of-range block assigned to the second split).
    start_row = (c * n_inner + i) * block_rows
    row_idx = start_row + jax.lax.broadcasted_iota(jnp.int32, lc.shape, 0)
    lc = jnp.where(row_idx < valid_rows, lc, 0.0)

    # VPU-only accumulation: fold the block down to one vreg-shaped (8, 128)
    # tile (the reshape is (8,128)-tile aligned, i.e. layout-free).  The single
    # cross-lane reduce happens once, in the wrapper.
    acc_ref[...] += jnp.sum(
        lc.reshape(block_rows // _SUBLANES, _SUBLANES, _LANES), axis=0)

    @pl.when(i == n_inner - 1)
    def _finalize():
        out_ref[...] = acc_ref[...]


def log_cosh_loss(y_pred, y_true):
    """Pallas TPU implementation of LogCoshLoss.forward(y_pred, y_true)."""
    assert y_pred.shape == y_true.shape, "shapes must match (no broadcasting)"
    n = y_pred.size
    assert n > 0

    yp = jnp.ravel(y_pred)   # keep original dtype; upcast happens in-kernel
    yt = jnp.ravel(y_true)

    # Pad only a sub-128-element tail when needed (zeros contribute exactly 0
    # to the sum under the stable formula).  When n % 128 == 0 this is a no-op
    # and the reshape below is a free bitcast.
    pad = (-n) % _LANES
    if pad:
        yp = jnp.pad(yp, (0, pad))
        yt = jnp.pad(yt, (0, pad))
    rows = (n + pad) // _LANES
    yp2 = yp.reshape(rows, _LANES)
    yt2 = yt.reshape(rows, _LANES)

    block_rows = min(_MAX_BLOCK_ROWS, _round_up(rows, _SUBLANES))
    n_blocks = pl.cdiv(rows, block_rows)
    n_inner = pl.cdiv(n_blocks, _NUM_SPLITS)

    def in_map(c, i):
        # Clamp so DMAs of fully out-of-range blocks stay in bounds; the
        # in-kernel row mask zeroes their contribution.
        return (jnp.minimum(c * n_inner + i, n_blocks - 1), 0)

    bytes_accessed = (
        yp2.size * yp2.dtype.itemsize
        + yt2.size * yt2.dtype.itemsize
        + _NUM_SPLITS * _SUBLANES * _LANES * 4
    )

    partials = pl.pallas_call(
        functools.partial(_logcosh_partial_kernel, valid_rows=rows),
        out_shape=jax.ShapeDtypeStruct(
            (_NUM_SPLITS * _SUBLANES, _LANES), jnp.float32),
        grid_spec=pltpu.PrefetchScalarGridSpec(
            num_scalar_prefetch=0,
            grid=(_NUM_SPLITS, n_inner),
            in_specs=[
                pl.BlockSpec((block_rows, _LANES), in_map),
                pl.BlockSpec((block_rows, _LANES), in_map),
            ],
            out_specs=pl.BlockSpec((_SUBLANES, _LANES), lambda c, i: (c, 0)),
            scratch_shapes=[pltpu.VMEM((_SUBLANES, _LANES), jnp.float32)],
        ),
        compiler_params=pltpu.CompilerParams(
            dimension_semantics=("parallel", "arbitrary"),
            vmem_limit_bytes=32 * 1024 * 1024,
        ),
        cost_estimate=pl.CostEstimate(
            flops=6 * n, transcendentals=2 * n, bytes_accessed=bytes_accessed),
    )(yp2, yt2)

    # Tiny final reduction + mean over the *true* element count.
    return (jnp.sum(partials) / jnp.float32(n)).astype(jnp.float32)


if __name__ == "__main__":
    key = jax.random.PRNGKey(0)
    k1, k2, k3, k4 = jax.random.split(key, 4)

    # Primary small shape consistent with a regression-style loss input.
    shape = (2, 4, 16, 16)
    y_pred = jax.random.normal(k1, shape, dtype=jnp.float32)
    y_true = jax.random.normal(k2, shape, dtype=jnp.float32)

    loss = log_cosh_loss(y_pred, y_true)
    jax.block_until_ready(loss)
    ref = jnp.mean(jnp.log(jnp.cosh(y_pred - y_true)))
    assert jnp.allclose(loss, ref, rtol=1e-5, atol=1e-6), (loss, ref)

    # A second, lane-ragged shape to exercise the tail-pad / row-mask path.
    shape2 = (3, 5, 7)   # 105 elements, not a multiple of 128
    y_pred2 = 2.0 * jax.random.normal(k3, shape2, dtype=jnp.float32)
    y_true2 = jax.random.normal(k4, shape2, dtype=jnp.float32)
    loss2 = log_cosh_loss(y_pred2, y_true2)
    jax.block_until_ready(loss2)
    ref2 = jnp.mean(jnp.log(jnp.cosh(y_pred2 - y_true2)))
    assert jnp.allclose(loss2, ref2, rtol=1e-5, atol=1e-6), (loss2, ref2)

    print("KERNEL_OK")
</pallas_src>

<mosaic_0001>
module attributes {stable_mosaic.version = 11 : i64} {
  func.func @_logcosh_partial_kernel(%arg0: i32, %arg1: i32, %arg2: memref<16x128xf32, #tpu.memory_space<vmem>>, %arg3: memref<16x128xf32, #tpu.memory_space<vmem>>, %arg4: memref<8x128xf32, #tpu.memory_space<vmem>>, %arg5: memref<8x128xf32, #tpu.memory_space<vmem>>) attributes {dimension_semantics = [#tpu.dimension_semantics<parallel>, #tpu.dimension_semantics<arbitrary>], iteration_bounds = array<i64: 2, 1>, scalar_prefetch = 0 : i64, scratch_operands = 1 : i64, tpu.core_type = #tpu.core_type<tc>, window_params = [{transform_indices = @transform_0, window_bounds = array<i64: 16, 128>}, {transform_indices = @transform_1, window_bounds = array<i64: 16, 128>}, {transform_indices = @transform_2, window_bounds = array<i64: 8, 128>}]} {
    %c0_i32 = arith.constant 0 : i32
    %0 = arith.cmpi eq, %arg1, %c0_i32 : i32
    %1 = arith.extui %0 : i1 to i32
    %c0_i32_0 = arith.constant 0 : i32
    %2 = arith.cmpi ne, %1, %c0_i32_0 : i32
    scf.if %2 {
      %cst_14 = arith.constant 0.000000e+00 : f32
      %32 = vector.broadcast %cst_14 : f32 to vector<8x128xf32>
      %c0_15 = arith.constant 0 : index
      %c0_16 = arith.constant 0 : index
      %33 = vector.load %arg5[%c0_15, %c0_16] : memref<8x128xf32, #tpu.memory_space<vmem>>, vector<8x128xf32>
      tpu.vector_store %arg5[%c0_15, %c0_16], %32 {strides = array<i32>} : memref<8x128xf32, #tpu.memory_space<vmem>>, vector<8x128xf32>,
    } else {
    }
    %c0 = arith.constant 0 : index
    %c0_1 = arith.constant 0 : index
    %3 = vector.load %arg2[%c0, %c0_1] : memref<16x128xf32, #tpu.memory_space<vmem>>, vector<16x128xf32>
    %c0_2 = arith.constant 0 : index
    %c0_3 = arith.constant 0 : index
    %4 = vector.load %arg3[%c0_2, %c0_3] : memref<16x128xf32, #tpu.memory_space<vmem>>, vector<16x128xf32>
    %5 = arith.subf %3, %4 : vector<16x128xf32>
    %6 = math.absf %5 : vector<16x128xf32>
    %cst = arith.constant -2.000000e+00 : f32
    %7 = vector.broadcast %cst : f32 to vector<16x128xf32>
    %8 = arith.mulf %7, %6 : vector<16x128xf32>
    %9 = math.exp %8 : vector<16x128xf32>
    %10 = math.log1p %9 : vector<16x128xf32>
    %11 = arith.addf %6, %10 : vector<16x128xf32>
    %cst_4 = arith.constant 0.693147182 : f32
    %12 = vector.broadcast %cst_4 : f32 to vector<16x128xf32>
    %13 = arith.subf %11, %12 : vector<16x128xf32>
    %c1_i32 = arith.constant 1 : i32
    %14 = arith.muli %arg0, %c1_i32 : i32
    %15 = arith.addi %14, %arg1 : i32
    %c16_i32 = arith.constant 16 : i32
    %16 = arith.muli %15, %c16_i32 : i32
    %17 = tpu.iota {dimensions = array<i32: 0>} : vector<16x128xi32>
    %18 = vector.broadcast %16 : i32 to vector<16x128xi32>
    %19 = arith.addi %18, %17 : vector<16x128xi32>
    %c16_i32_5 = arith.constant 16 : i32
    %20 = vector.broadcast %c16_i32_5 : i32 to vector<16x128xi32>
    %21 = arith.cmpi slt, %19, %20 : vector<16x128xi32>
    %cst_6 = arith.constant 0.000000e+00 : f32
    %22 = vector.broadcast %cst_6 : f32 to vector<16x128xf32>
    %23 = arith.select %21, %13, %22 : vector<16x128xi1>, vector<16x128xf32>
    %c0_7 = arith.constant 0 : index
    %c0_8 = arith.constant 0 : index
    %24 = vector.load %arg5[%c0_7, %c0_8] : memref<8x128xf32, #tpu.memory_space<vmem>>, vector<8x128xf32>
    %25 = vector.shape_cast %23 : vector<16x128xf32> to vector<2x8x128xf32>
    %cst_9 = arith.constant dense<0.000000e+00> : vector<8x128xf32>
    %26 = vector.multi_reduction <add>, %25, %cst_9 [0] : vector<2x8x128xf32> to vector<8x128xf32>
    %27 = arith.addf %24, %26 : vector<8x128xf32>
    %c0_10 = arith.constant 0 : index
    %c0_11 = arith.constant 0 : index
    %28 = vector.load %arg5[%c0_10, %c0_11] : memref<8x128xf32, #tpu.memory_space<vmem>>, vector<8x128xf32>
    tpu.vector_store %arg5[%c0_10, %c0_11], %27 {strides = array<i32>} : memref<8x128xf32, #tpu.memory_space<vmem>>, vector<8x128xf32>,
    %c0_i32_12 = arith.constant 0 : i32
    %29 = arith.cmpi eq, %arg1, %c0_i32_12 : i32
    %30 = arith.extui %29 : i1 to i32
    %c0_i32_13 = arith.constant 0 : i32
    %31 = arith.cmpi ne, %30, %c0_i32_13 : i32
    scf.if %31 {
      %c0_14 = arith.constant 0 : index
      %c0_15 = arith.constant 0 : index
      %32 = vector.load %arg5[%c0_14, %c0_15] : memref<8x128xf32, #tpu.memory_space<vmem>>, vector<8x128xf32>
      %c0_16 = arith.constant 0 : index
      %c0_17 = arith.constant 0 : index
      %33 = vector.load %arg4[%c0_16, %c0_17] : memref<8x128xf32, #tpu.memory_space<vmem>>, vector<8x128xf32>
      tpu.vector_store %arg4[%c0_16, %c0_17], %32 {strides = array<i32>} : memref<8x128xf32, #tpu.memory_space<vmem>>, vector<8x128xf32>,
    } else {
    }
    return
  }
  func.func @transform_0(%arg0: i32, %arg1: i32) -> (i32, i32) {
    %c1_i32 = arith.constant 1 : i32
    %0 = arith.muli %arg0, %c1_i32 : i32
    %1 = arith.addi %0, %arg1 : i32
    %c0_i32 = arith.constant 0 : i32
    %2 = arith.minsi %1, %c0_i32 : i32
    %c0_i32_0 = arith.constant 0 : i32
    %c0_i32_1 = arith.constant 0 : i32
    return %2, %c0_i32_0 : i32, i32
  }
  func.func @transform_1(%arg0: i32, %arg1: i32) -> (i32, i32) {
    %c1_i32 = arith.constant 1 : i32
    %0 = arith.muli %arg0, %c1_i32 : i32
    %1 = arith.addi %0, %arg1 : i32
    %c0_i32 = arith.constant 0 : i32
    %2 = arith.minsi %1, %c0_i32 : i32
    %c0_i32_0 = arith.constant 0 : i32
    %c0_i32_1 = arith.constant 0 : i32
    return %2, %c0_i32_0 : i32, i32
  }
  func.func @transform_2(%arg0: i32, %arg1: i32) -> (i32, i32) {
    %c0_i32 = arith.constant 0 : i32
    %c0_i32_0 = arith.constant 0 : i32
    return %arg0, %c0_i32 : i32, i32
  }
}

</mosaic_0001>

<bundles_post_ra>
// kernel: tpu_custom_call.1
= control target key start
LH: loop header
LB: loop body
LE: loop exit
PB: predicated region body
PF: predicated region fallthrough
CT: control target
= control target key end

     0   :  { %7 = vsyncpa [#allocation4], 0  ;;  %s938_s0 = inlined_call_operand.hbm [shape: f32[16,128], index: 0, kind: input, shape index: {}]   ;;  %s939_s1 = inlined_call_operand.hbm [shape: f32[16,128], index: 1, kind: input, shape index: {}]   ;;  %s940_s2 = inlined_call_operand.hbm [shape: f32[16,128], index: 2, kind: output, shape index: {}]  }
   0x1   :  { %9 = vsyncpa [#allocation4 + $0x1], 0 }
   0x2   :  { %10 = vsyncpa [#allocation7], 0 }
   0x3   :  { %12 = vsyncpa [#allocation7 + $0x1], 0 }
   0x4   :  { %13 = vsyncpa [#allocation5], 0 }
   0x5   :  { %15 = vsyncpa [#allocation5 + $0x1], 0  ;;  %s730_s9 = smov 0   ;;  %s732_s10 = smov 0  }
   0x6   :  { %s734_s11 = smov 0   ;;  %s736_s12 = smov 0  }
   0x7   :  { %s738_s13 = smov 0   ;;  %s740_s14 = smov 0  }
   0x8   :  { %s742_s15 = smov 0   ;;  %s744_s16 = smov 0  }
   0x9 LB: > { %s417_s17 = sadd.s32 4294967295, %s708_s16   ;;  %s418_s18 = sadd.s32 4294967294, %s708_s16   ;;  %s708_s16 = sphi %s744_s16, %s21_s16   ;;  %s704_s15 = sphi %s742_s15, %s959_s15   ;;  %s700_s14 = sphi %s740_s14, %s958_s14   ;;  %s696_s13 = sphi %s738_s13, %s928_s13   ;;  %s692_s12 = sphi %s736_s12, %s957_s12   ;;  %s688_s11 = sphi %s734_s11, %s956_s11   ;;  %s684_s10 = sphi %s732_s10, %s955_s10   ;;  %s680_s9 = sphi %s730_s9, %s954_s9  }
   0xa   : > { %s33_s19 = sadd.s32 1, %s704_s15  ;;  %p677_p1 = scmp.ne.s32.totalorder %s696_s13, 0 }
   0xb   : > { %p35_p0 = scmp.ge.s32.totalorder %s33_s19, 2  ;;  %p54_p2 = scmp.eq.s32.totalorder %s708_s16, 0 }
   0xc   : > { %p59_p3 = scmp.ne.s32.totalorder %s696_s13, %s692_s12  ;;  %p60_p5 = scmp.eq.s32.totalorder %s417_s17, 0 }
   0xd   : > { %s961_s19 = smov (%p35_p0, %s33_s19), 0  ;;  %p776_p4 = por %p677_p1, %p54_p2 }
   0xe   : > { %p780_p6 = por %p60_p5, %p59_p3  ;;  %s101_s22 = ssub.s32 %s704_s15, %s961_s19 }
   0xf   : > { %p102_p7 = scmp.eq.s32.totalorder %s101_s22, 0  ;;  %s104_s23 = sadd.s32 1, %s688_s11 }
  0x10   : > { %s944_s21 = scalar_select %p780_p6, 1, 0 }
  0x11   : > { %s788_s24 = scalar_select %p102_p7, %s688_s11, %s104_s23  }
  0x12   : > { %p114_p8 = scmp.ne.s32.totalorder %s688_s11, %s684_s10  ;;  %p115_p9 = scmp.eq.s32.totalorder %s417_s17, 1 }
  0x13   : > { %p120_p10 = scmp.ne.s32.totalorder %s684_s10, %s680_s9  ;;  %p121_p11 = scmp.eq.s32.totalorder %s418_s18, 1 }
  0x14   : > { %p794_p12 = por %p115_p9, %p114_p8  ;;  %p457_p1 = scmp.lt.s32.totalorder %s708_s16, 2 }
  0x15   : > { %p799_p0 = por %p121_p11, %p120_p10  ;;  %s710_s27 = smov [#allocation3]  }
  0x16   : > { %s945_s25 = scalar_select %p794_p12, 1, 0 }
  0x17   : > { %s946_s26 = scalar_select %p799_p0, 1, 0 }
  0x18   : > { %s155_s28 = sshll.u32 %s710_s27, 4  ;;  %p806_p2 = pnand %p457_p1, %p776_p4  ;;  %s156_s28 = int_to_ptr.vmem [resolvable:$true] %s155_s28 }
  0x19   : > { %s541_s4 = scalar_lea.hbm %s938_s0, 256 }
  0x1a   : > { %p542_p3 = scmp.ne.s32.totalorder %s938_s0, %s541_s4  ;;  %p543_p5 = pneg %p806_p2 }
  0x1b   : > { %p548_p8 = scmp.lt.u32.totalorder %s541_s4, %s541_s4  ;;  %p550_p9 = scmp.lt.u32.totalorder %s541_s4, %s938_s0 }
  0x1c   : > { %p544_p7 = pnand %p543_p5, %p542_p3 }
  0x1d   : > { %p551_p10 = por %p550_p9, %p548_p8 }
  0x1e   : > { %p545_p4 = pneg %p544_p7 }
  0x20   : > { %p552_p11 = pnand %p551_p10, %p545_p4 }
  0x22   : > { %555 = shalt.err (!%p552_p11)
}
  0x23   : > { %s556_s12 = scalar_lea.vmem %s156_s28, 256  ;;  %s563_s17 = scalar_lea.vmem %s156_s28, 512 }
  0x24   : > { %p557_p1 = scmp.ne.s32.totalorder %s156_s28, %s556_s12  ;;  %p564_p12 = scmp.lt.s32.totalorder %s156_s28, %s156_s28 }
  0x25   : > { %p565_p6 = scmp.lt.s32.totalorder %s563_s17, %s556_s12 }
  0x26   : > { %p559_p13 = pnand %p557_p1, %p543_p5 }
  0x27   : > { %p566_p3 = por %p565_p6, %p564_p12 }
  0x28   : > { %p560_p0 = pneg %p559_p13 }
  0x2a   : > { %p567_p7 = pnand %p566_p3, %p560_p0 }
  0x2c   : > { %570 = shalt.err (!%p567_p7)
}
  0x2d   : > { %s711_s18 = smov 128   ;;  %s712_s20 = smov 8  }
  0x2e   : > { %449 = dma.hbm_to_vmem [thread:$0]  (!%p806_p2), %s938_s0, 256, %s156_s28, [#allocation4], %s711_s18, %s711_s18, %s712_s20  }
  0x2f   : > { %p427_p13 = scmp.ge.s32.totalorder %s708_s16, 1  ;;  %p187_p4 = scmp.lt.s32.totalorder %s708_s16, 3 }
  0x30   : > { %s713_s30 = smov [#allocation6]   ;;  %s571_s6 = scalar_lea.hbm %s939_s1, 256 }
  0x31   : > { %p837_p8 = pnand %p427_p13, %p187_p4  ;;  %s179_s3 = sshll.u32 %s713_s30, 4  ;;  %s180_s3 = int_to_ptr.vmem [resolvable:$true] %s179_s3 }
  0x32   : > { %p572_p6 = scmp.ne.s32.totalorder %s939_s1, %s571_s6  ;;  %p578_p9 = scmp.lt.u32.totalorder %s571_s6, %s571_s6 }
  0x33   : > { %s948_s27 = scalar_select %p837_p8, 1, 0 }
  0x34   : > { %p574_p12 = pnand %p572_p6, %p543_p5  ;;  %p580_p10 = scmp.lt.u32.totalorder %s571_s6, %s939_s1 }
  0x36   : > { %p575_p0 = pneg %p574_p12  ;;  %p581_p11 = por %p580_p10, %p578_p9 }
  0x38   : > { %p582_p1 = pnand %p581_p11, %p575_p0 }
  0x3a   : > { %585 = shalt.err (!%p582_p1)
}
  0x3b   : > { %s586_s17 = scalar_lea.vmem %s180_s3, 256  ;;  %s593_s22 = scalar_lea.vmem %s180_s3, 512 }
  0x3c   : > { %p587_p3 = scmp.ne.s32.totalorder %s180_s3, %s586_s17  ;;  %p594_p4 = scmp.lt.s32.totalorder %s180_s3, %s180_s3 }
  0x3d   : > { %p595_p8 = scmp.lt.s32.totalorder %s593_s22, %s586_s17 }
  0x3e   : > { %p589_p7 = pnand %p587_p3, %p543_p5 }
  0x3f   : > { %p596_p6 = por %p595_p8, %p594_p4 }
  0x40   : > { %p590_p13 = pneg %p589_p7 }
  0x42   : > { %p597_p12 = pnand %p596_p6, %p590_p13 }
  0x44   : > { %600 = shalt.err (!%p597_p12)
}
  0x45   : > { %452 = dma.hbm_to_vmem [thread:$0]  (!%p806_p2), %s939_s1, 256, %s180_s3, [#allocation7], %s711_s18, %s711_s18, %s712_s20  }
  0x46   : > { %p949_p0 = scmp.ne.s32.totalorder %s948_s27, 0 }
  0x47   : > { %s193_s4 = sand.u32 (!%p949_p0), 1, %s696_s13   ;;  %p950_p5 = scmp.ne.s32.totalorder (!%p949_p0), %s944_s21, 0 }
  0x48   : > { %191 = sbr.rel (%p949_p0) target bundleno = 141 (0x8d), region = 28  ;;  %s428_s5 = sshll.u32 (!%p949_p0), %s193_s4, 4 }
  0x49   : > { %s194_s6 = scalar_lea.sflag (!%p949_p0), [#allocation4], %s193_s4  ;;  %s197_s7 = scalar_lea.vmem (!%p949_p0), [#allocation3], %s428_s5 }
  0x4f   : > { %666 = dma.done.wait (%p950_p5), %s194_s6, 256  }
  0x50   : > { %668 = vsyncadd (%p950_p5), %s194_s6, 4294967040  ;;  %s203_s29 = scalar_lea.sflag [#allocation7], %s193_s4  ;;  %s206_s8 = scalar_lea.vmem [#allocation6], %s428_s5 }
  0x51   : > { %670 = dma.done.wait (%p950_p5), %s203_s29, 256  }
  0x52   : > { %672 = vsyncadd (%p950_p5), %s203_s29, 4294967040  ;;  %v245_v0 = vld [vmem:[%s197_s7] sm:$0xff]  ;;  %v246_v1 = vld [vmem:[%s197_s7 + $0x8] sm:$0xff]  ;;  %v283_v16 = vlaneseq  ;;  %s433_s21 = sshll.u32 %s700_s14, 4  ;;  %s229_s18 = sand.u32 1, %s684_s10  }
  0x53   : > { %v247_v2 = vld [vmem:[%s206_s8] sm:$0xff]  ;;  %v248_v3 = vld [vmem:[%s206_s8 + $0x8] sm:$0xff]  ;;  %v286_v25 = vstv %s433_s21  ;;  %s430_s20 = sshll.u32 %s229_s18, 3  ;;  %s435_s28 = sshll.u32 %s700_s14, 7 }
  0x54   : > { %v249_v4 = vsub.f32 %v245_v0, %v247_v2  ;;  %v250_v5 = vsub.f32 %v246_v1, %v248_v3  ;;  %v284_v19 = vshrl.u32 %v283_v16, 7  ;;  %s231_s27 = scalar_lea.vmem [#allocation8], %s430_s20  ;;  %s885_s22 = scalar_lea.hbm %s940_s2, %s435_s28 }
  0x55   : > { %s316_s3 = sshll.u32 %s231_s27, 4  ;;  %s303_s23 = scalar_lea.sflag [#allocation5], %s229_s18  ;;  %s880_s3 = int_to_ptr.vmem [resolvable:$true] %s316_s3 }
  0x56   : > { %v251_v6 = vand.u32 2147483647, %v249_v4  ;;  %v252_v7 = vand.u32 2147483647, %v250_v5  ;;  %v285_v24 = vadd.s32 8, %v284_v19  ;;  %v287_v31 = vadd.s32 %v286_v25, %v284_v19  ;;  %s601_s30 = scalar_lea.vmem %s880_s3, 128 }
  0x57   : > { %p602_p2 = scmp.ne.s32.totalorder %s880_s3, %s601_s30  ;;  %p951_p8 = scmp.ne.s32.totalorder %s945_s25, 0 }
  0x58   : > { %v253_v8 = vmul.f32 -2.0, %v251_v6  ;;  %v254_v9 = vmul.f32 -2.0, %v252_v7  ;;  %v288_v33 = vadd.s32 %v286_v25, %v285_v24  ;;  %vm289_vm2 = vcmp.lt.s32.totalorder %v287_v31, 16  ;;  %s714_s14 = smov [#allocation8]  }
  0x59   : > { %p603_p9 = pnand %p602_p2, %p951_p8  ;;  %s605_s4 = sshll.u32 %s714_s14, 4  ;;  %s606_s4 = int_to_ptr.vmem [resolvable:$false] %s605_s4 }
  0x5a   : > { %v255_v10 = vmul.f32 1.442695, %v253_v8  ;;  %v257_v11 = vmul.f32 1.442695, %v254_v9  ;;  %vm290_vm3 = vcmp.lt.s32.totalorder %v288_v33, 16  ;;  %s607_s5 = scalar_lea.vmem %s606_s4, 256  ;;  %p608_p11 = scmp.lt.s32.totalorder %s880_s3, %s606_s4 }
  0x5b   : > { %p604_p10 = pneg %p603_p9  ;;  %p609_p1 = scmp.lt.s32.totalorder %s607_s5, %s601_s30 }
  0x5c   : > { %533 = vpow2.f32 %v255_v10 }
  0x5d   : > { %535 = vpow2.f32 %v257_v11  ;;  %p610_p3 = por %p609_p1, %p608_p11 }
  0x5f   : > { %p611_p7 = pnand %p610_p3, %p604_p10 }
  0x66   : > { %v534_v12 = vpop.eup %533 }
  0x67   : > { %v536_v13 = vpop.eup %535  ;;  %v259_v14 = vadd.f32 1.0, %v534_v12  ;;  %v262_v17 = vmul.f32 -0.5, %v534_v12  ;;  %v265_v21 = vand.u32 2147483647, %v534_v12 }
  0x68   : > { %v268_v15 = vadd.f32 1.0, %v536_v13  ;;  %v271_v18 = vmul.f32 -0.5, %v536_v13  ;;  %v274_v23 = vand.u32 2147483647, %v536_v13 }
  0x69   : > { %537 = vlog2.f32 %v259_v14  ;;  %v263_v20 = vadd.f32 1.0, %v262_v17  ;;  %vm266_vm0 = vcmp.lt.f32.partialorder %v265_v21, 0.0004427343 }
  0x6a   : > { %539 = vlog2.f32 %v268_v15  ;;  %v272_v22 = vadd.f32 1.0, %v271_v18  ;;  %vm275_vm1 = vcmp.lt.f32.partialorder %v274_v23, 0.0004427343 }
  0x6b   : > { %v264_v26 = vmul.f32 %v534_v12, %v263_v20 }
  0x6c   : > { %v273_v28 = vmul.f32 %v536_v13, %v272_v22 }
  0x73   : > { %v538_v27 = vpop.eup %537 }
  0x74   : > { %v540_v29 = vpop.eup %539  ;;  %v261_v30 = vmul.f32 0.6931472, %v538_v27 }
  0x75   : > { %v270_v32 = vmul.f32 0.6931472, %v540_v29 }
  0x76   : > { %v267_v34 = vsel %vm266_vm0, %v264_v26, %v261_v30 }
  0x77   : > { %v276_v35 = vsel %vm275_vm1, %v273_v28, %v270_v32  ;;  %v277_v36 = vadd.f32 %v267_v34, %v251_v6 }
  0x78   : > { %v278_v37 = vadd.f32 %v276_v35, %v252_v7 }
  0x79   : > { %v431_v38 = vadd.f32 -0.6931472, %v277_v36 }
  0x7a   : > { %v432_v39 = vadd.f32 -0.6931472, %v278_v37 }
  0x7b   : > { %v291_v40 = vsel %vm289_vm2, %v431_v38, 0.0 }
  0x7c   : > { %v292_v41 = vsel %vm290_vm3, %v432_v39, 0.0 }
  0x7d   : > { %v294_v42 = vadd.f32 %v292_v41, %v291_v40 }
  0x7f   : > { %301 = vst [vmem:[%s231_s27] sm:$0xff] %v294_v42 }
  0x80   : > { %614 = shalt.err (!%p611_p7)
}
  0x81   : > { %s615_s6 = scalar_lea.hbm %s885_s22, 128  ;;  %s619_s8 = scalar_lea.hbm %s940_s2, 256 }
  0x82   : > { %p616_p13 = scmp.ne.s32.totalorder %s885_s22, %s615_s6  ;;  %p620_p12 = scmp.lt.u32.totalorder %s885_s22, %s940_s2 }
  0x83   : > { %p621_p0 = scmp.lt.u32.totalorder %s619_s8, %s615_s6  ;;  %p623_p2 = scmp.lt.u32.totalorder %s615_s6, %s885_s22 }
  0x84   : > { %p617_p4 = pnand %p616_p13, %p951_p8 }
  0x85   : > { %p622_p5 = por %p621_p0, %p620_p12 }
  0x86   : > { %p618_p6 = pneg %p617_p4 }
  0x87   : > { %p624_p9 = por %p623_p2, %p622_p5 }
  0x89   : > { %p625_p10 = pnand %p624_p9, %p618_p6 }
  0x8b   : > { %628 = shalt.err (!%p625_p10)
}
  0x8c   : > { %444 = dma.vmem_to_hbm [thread:$0]  (%p951_p8), %s880_s3, 128, %s885_s22, %s303_s23  }
  0x8d PF: > { %s328_s20 = sand.u32 1, %s680_s9   ;;  %p952_p11 = scmp.ne.s32.totalorder %s946_s26, 0 }
  0x8e   : > { %p953_p1 = scmp.ge.s32.totalorder %s708_s16, 2  ;;  %s329_s27 = scalar_lea.sflag [#allocation5], %s328_s20 }
  0x90   : > { %p454_p3 = pnand %p953_p1, %p952_p11 }
  0x92   : > { %674 = dma.done.wait (!%p454_p3), %s329_s27, 128  }
  0x93   : > { %676 = vsyncadd (!%p454_p3), %s329_s27, 4294967168  ;;  %s21_s16 = sadd.s32 1, %s708_s16   ;;  %s954_s9 = smov %s684_s10 }
  0x94   : > { %p18_p7 = scmp.ge.s32.totalorder %s21_s16, 4   ;;  %s955_s10 = smov %s688_s11 }
  0x95   : > { %s956_s11 = smov %s788_s24  ;;  %s957_s12 = smov %s696_s13 }
  0x96   : > { %s928_s13 = smov 0   ;;  %s958_s14 = smov %s704_s15 }
  0x97   : > { %s959_s15 = smov %s961_s19  ;;  %20 = sbr.rel (!%p18_p7) target bundleno = 9 (0x9), region = 94 }
  0x9e   :  { %334 = vsyncpa [#allocation4], 1 }
  0x9f   :  { %336 = vsyncpa [#allocation4 + $0x1], 1 }
  0xa0   :  { %337 = vsyncpa [#allocation7], 1 }
  0xa1   :  { %339 = vsyncpa [#allocation7 + $0x1], 1 }
  0xa2   :  { %340 = vsyncpa [#allocation5], 1 }
  0xa3   :  { %342 = vsyncpa [#allocation5 + $0x1], 1 }

</bundles_post_ra>
